<compile_context>
chip_gen: v5e
topology: v5e:2x2
jax: 0.10.0
libtpu: 0.0.40
codegen_flags: <defaults>
</compile_context>

<pallas_src>
import jax
import jax.numpy as jnp
from jax.experimental import pallas as pl
from jax.experimental.pallas import tpu as pltpu


def _round_up(a: int, b: int) -> int:
    return (a + b - 1) // b * b


def _cdiv(a: int, b: int) -> int:
    return -(-a // b)


# ---------------------------------------------------------------------------
# Kernels
# ---------------------------------------------------------------------------
def _spconv_kernel(z_ref, w_ref, b_ref, o_ref):
    """o = z @ W + b.  Whole K and N resident per row tile (common case)."""
    acc = jnp.dot(z_ref[...], w_ref[...], preferred_element_type=jnp.float32)
    o_ref[...] = (acc + b_ref[...]).astype(o_ref.dtype)


def _spconv_kernel_ksplit(z_ref, w_ref, b_ref, o_ref, acc_ref):
    """o = z @ W + b with the contraction split over grid axis 2 (huge K)."""
    k = pl.program_id(2)

    @pl.when(k == 0)
    def _():
        acc_ref[...] = jnp.zeros_like(acc_ref)

    acc_ref[...] += jnp.dot(z_ref[...], w_ref[...],
                            preferred_element_type=jnp.float32)

    @pl.when(k == pl.num_programs(2) - 1)
    def _():
        o_ref[...] = (acc_ref[...] + b_ref[...]).astype(o_ref.dtype)


# ---------------------------------------------------------------------------
# Wrapper
# ---------------------------------------------------------------------------
def downsample_sp_conv(x, weight, bias, *, out_dtype=None, nchw_out=True,
                       vmem_budget_bytes=48 * 1024 * 1024,
                       tile_k=512, tile_n=512, force_ksplit=False):
    """
    x:      (B, C, H, W)   NCHW, H and W even
    weight: (dim_out, 4*C) the PyTorch Conv2d 1x1 weight[..., 0, 0]
    bias:   (dim_out,)
    returns (B, dim_out, H//2, W//2)  (or NHWC if nchw_out=False)
    """
    B, C, H, W = x.shape
    assert H % 2 == 0 and W % 2 == 0, "H, W must be even for SP-conv downsample"
    dim_out, k_in = weight.shape
    assert k_in == 4 * C

    Ho, Wo = H // 2, W // 2
    M = B * Ho * Wo
    K = 4 * C
    N = dim_out
    out_dtype = x.dtype if out_dtype is None else jnp.dtype(out_dtype)
    out_bytes = jnp.dtype(out_dtype).itemsize

    # --- pixel-unshuffle to channels-last: a single fused XLA transpose pass,
    # with the bf16 cast folded in.  Channel order matches einops '(c s1 s2)',
    # i.e. k = c*4 + s1*2 + s2.  The activation K dim is NOT zero-padded in HBM.
    # TODO(synk): fuse the unshuffle itself into the kernel (strided VMEM loads
    # from NCHW) so the activation is read from HBM exactly once.
    z = (x.reshape(B, C, Ho, 2, Wo, 2)
           .transpose(0, 2, 4, 1, 3, 5)
           .reshape(M, K)
           .astype(jnp.bfloat16))
    wt = weight.T.astype(jnp.bfloat16)                       # (K, N)
    bvec = bias.astype(jnp.float32).reshape(1, N)

    # Pad only the (small) weight/bias N dim when dim_out is not 128-aligned,
    # so MXU output lanes stay dense.  No padding when dim_out % 128 == 0.
    Np = N if N % 128 == 0 else _round_up(N, 128)
    if Np != N:
        wt = jnp.pad(wt, ((0, 0), (0, Np - N)))
        bvec = jnp.pad(bvec, ((0, 0), (0, Np - N)))

    # Path choice: keep the whole (K, Np) bf16 weight resident in VMEM if it
    # fits comfortably (counting double buffering); otherwise split K (and N).
    weight_vmem = 2 * K * Np * 2 + 2 * Np * 4
    use_ksplit = force_ksplit or (weight_vmem > vmem_budget_bytes // 2)

    if not use_ksplit:
        # -------- Path A: weight resident, 1-D grid over pixel rows ----------
        per_row = 2 * K * 2 + 2 * Np * out_bytes             # z + out, 2 buffers
        tm_cap = max(16, (vmem_budget_bytes - weight_vmem) // per_row)
        tm_cap = min(tm_cap, 2048)
        if M > 512:
            # keep >= 2 row tiles so the "parallel" axis can shard over 2 TCs
            tm_cap = min(tm_cap, _round_up(_cdiv(M, 2), 16))
        if tm_cap >= M:
            tm = M                                           # single full-dim block
        elif tm_cap >= 512:
            tm = tm_cap // 256 * 256                         # 256-aligned big tiles
        else:
            tm = max(16, tm_cap // 16 * 16)                  # bf16 sublane packing
        gm = _cdiv(M, tm)

        footprint = 2 * tm * K * 2 + weight_vmem + 2 * tm * Np * out_bytes
        vmem_limit = max(32 * 1024 * 1024,
                         min(footprint + 16 * 1024 * 1024, 128 * 1024 * 1024))

        cost = pl.CostEstimate(
            flops=2 * M * K * Np, transcendentals=0,
            bytes_accessed=(M * K * 2 + K * Np * 2 + Np * 4
                            + M * Np * out_bytes))           # weight fetched once

        out = pl.pallas_call(
            _spconv_kernel,
            out_shape=jax.ShapeDtypeStruct((M, Np), out_dtype),
            grid_spec=pltpu.PrefetchScalarGridSpec(
                num_scalar_prefetch=0,
                grid=(gm,),
                in_specs=[
                    pl.BlockSpec((tm, K), lambda i: (i, 0)),    # pixel-row tile
                    pl.BlockSpec((K, Np), lambda i: (0, 0)),    # resident weight
                    pl.BlockSpec((1, Np), lambda i: (0, 0)),    # resident bias
                ],
                out_specs=pl.BlockSpec((tm, Np), lambda i: (i, 0)),
            ),
            compiler_params=pltpu.CompilerParams(
                dimension_semantics=("parallel",),
                vmem_limit_bytes=vmem_limit),
            cost_estimate=cost,
        )(z, wt, bvec)
    else:
        # -------- Path B: K split (+ N tiling) with f32 accumulator ----------
        tk = max(128, min(tile_k, _round_up(K, 128)) // 128 * 128)
        # largest multiple of 128 <= tile_n that divides Np (no extra N pad)
        tn = 128
        cand = max(128, min(tile_n, Np) // 128 * 128)
        while cand >= 128:
            if Np % cand == 0:
                tn = cand
                break
            cand -= 128
        Kp = _round_up(K, tk)
        zp = jnp.pad(z, ((0, 0), (0, Kp - K))) if Kp != K else z
        wp = jnp.pad(wt, ((0, Kp - K), (0, 0))) if Kp != K else wt

        per_row = 2 * tk * 2 + 2 * tn * out_bytes + tn * 4   # z + out bufs + acc
        fixed = 2 * tk * tn * 2 + 2 * tn * 4                 # weight + bias bufs
        tm_cap = max(16, (vmem_budget_bytes - fixed) // per_row)
        tm = max(16, min(512, tm_cap // 16 * 16, _round_up(M, 16)))
        gm, gn, gk = _cdiv(M, tm), Np // tn, Kp // tk

        footprint = (2 * tm * tk * 2 + fixed + 2 * tm * tn * out_bytes
                     + tm * tn * 4)
        vmem_limit = max(32 * 1024 * 1024,
                         min(footprint + 16 * 1024 * 1024, 128 * 1024 * 1024))

        cost = pl.CostEstimate(
            flops=2 * M * Kp * Np, transcendentals=0,
            # z re-fetched per N tile, weight per M tile (grid (i, j, k), k inner)
            bytes_accessed=(gn * M * Kp * 2 + gm * Kp * Np * 2
                            + Np * 4 + M * Np * out_bytes))

        out = pl.pallas_call(
            _spconv_kernel_ksplit,
            out_shape=jax.ShapeDtypeStruct((M, Np), out_dtype),
            grid_spec=pltpu.PrefetchScalarGridSpec(
                num_scalar_prefetch=0,
                grid=(gm, gn, gk),
                in_specs=[
                    pl.BlockSpec((tm, tk), lambda i, j, k: (i, k)),
                    pl.BlockSpec((tk, tn), lambda i, j, k: (k, j)),
                    pl.BlockSpec((1, tn), lambda i, j, k: (0, j)),
                ],
                out_specs=pl.BlockSpec((tm, tn), lambda i, j, k: (i, j)),
                scratch_shapes=[pltpu.VMEM((tm, tn), jnp.float32)],
            ),
            compiler_params=pltpu.CompilerParams(
                dimension_semantics=("parallel", "parallel", "arbitrary"),
                vmem_limit_bytes=vmem_limit),
            cost_estimate=cost,
        )(zp, wp, bvec)

    y = out[:, :N] if Np != N else out
    y = y.reshape(B, Ho, Wo, N)
    if nchw_out:
        # TODO(synk): skip this extra HBM pass when the consumer accepts NHWC.
        y = y.transpose(0, 3, 1, 2)
    return y


def downsample_sp_conv_reference(x, weight, bias):
    """Pure-JAX f32 reference of the PyTorch module forward."""
    B, C, H, W = x.shape
    Ho, Wo = H // 2, W // 2
    z = x.astype(jnp.float32).reshape(B, C, Ho, 2, Wo, 2)
    z = z.transpose(0, 1, 3, 5, 2, 4).reshape(B, 4 * C, Ho, Wo)   # 'b (c s1 s2) h w'
    y = jnp.einsum("oc,bchw->bohw", weight.astype(jnp.float32), z,
                   precision=jax.lax.Precision.HIGHEST)
    return y + bias.astype(jnp.float32)[None, :, None, None]


if __name__ == "__main__":
    key = jax.random.PRNGKey(0)
    kx, kw, kb, kx2, kw2, kb2 = jax.random.split(key, 6)

    # ---- test 1: module-default shapes (dim_out = dim), weight-resident path
    B, C, H, W = 2, 4, 16, 16
    dim_out = C  # default(dim_out, dim)
    x = jax.random.normal(kx, (B, C, H, W), dtype=jnp.float32)
    weight = jax.random.normal(kw, (dim_out, 4 * C), dtype=jnp.float32) / jnp.sqrt(4 * C)
    bias = jax.random.normal(kb, (dim_out,), dtype=jnp.float32) * 0.02

    out = jax.block_until_ready(downsample_sp_conv(x, weight, bias))
    assert out.shape == (B, dim_out, H // 2, W // 2), out.shape
    assert out.dtype == x.dtype, out.dtype

    # Tight check vs a reference fed the same bf16-rounded operands
    # (isolates kernel math from the intentional MXU operand precision).
    ref_bf16 = downsample_sp_conv_reference(
        x.astype(jnp.bfloat16).astype(jnp.float32),
        weight.astype(jnp.bfloat16).astype(jnp.float32), bias)
    assert jnp.allclose(out, ref_bf16, atol=1e-3, rtol=1e-3), "path A: bf16-operand mismatch"
    # Loose check vs the full-f32 PyTorch-equivalent forward.
    ref_f32 = downsample_sp_conv_reference(x, weight, bias)
    assert jnp.allclose(out, ref_f32, atol=5e-2, rtol=5e-2), "path A: f32 mismatch"

    # ---- test 2: K-split / accumulator path (forced), unaligned dim_out ----
    B2, C2, H2, W2, dim_out2 = 2, 64, 8, 8, 100
    x2 = jax.random.normal(kx2, (B2, C2, H2, W2), dtype=jnp.float32)
    weight2 = jax.random.normal(kw2, (dim_out2, 4 * C2), dtype=jnp.float32) / jnp.sqrt(4 * C2)
    bias2 = jax.random.normal(kb2, (dim_out2,), dtype=jnp.float32) * 0.02

    out2 = jax.block_until_ready(
        downsample_sp_conv(x2, weight2, bias2,
                           force_ksplit=True, tile_k=128, tile_n=128))
    assert out2.shape == (B2, dim_out2, H2 // 2, W2 // 2), out2.shape

    ref2_bf16 = downsample_sp_conv_reference(
        x2.astype(jnp.bfloat16).astype(jnp.float32),
        weight2.astype(jnp.bfloat16).astype(jnp.float32), bias2)
    assert jnp.allclose(out2, ref2_bf16, atol=2e-3, rtol=2e-3), "path B: bf16-operand mismatch"
    ref2_f32 = downsample_sp_conv_reference(x2, weight2, bias2)
    assert jnp.allclose(out2, ref2_f32, atol=5e-2, rtol=5e-2), "path B: f32 mismatch"

    print("KERNEL_OK")
</pallas_src>

<mosaic_0001>
module attributes {stable_mosaic.version = 11 : i64} {
  func.func @_spconv_kernel(%arg0: i32, %arg1: memref<128x16xbf16, #tpu.memory_space<vmem>>, %arg2: memref<16x128xbf16, #tpu.memory_space<vmem>>, %arg3: memref<1x128xf32, #tpu.memory_space<vmem>>, %arg4: memref<128x128xf32, #tpu.memory_space<vmem>>) attributes {dimension_semantics = [#tpu.dimension_semantics<parallel>], iteration_bounds = array<i64: 1>, scalar_prefetch = 0 : i64, scratch_operands = 0 : i64, tpu.core_type = #tpu.core_type<tc>, window_params = [{transform_indices = @transform_0, window_bounds = array<i64: 128, 16>}, {pipeline_mode = #tpu.pipeline_mode<synchronous>, transform_indices = @transform_1, window_bounds = array<i64: 16, 128>}, {pipeline_mode = #tpu.pipeline_mode<synchronous>, transform_indices = @transform_2, window_bounds = array<i64: 1, 128>}, {transform_indices = @transform_3, window_bounds = array<i64: 128, 128>}]} {
    %c0 = arith.constant 0 : index
    %c0_0 = arith.constant 0 : index
    %0 = vector.load %arg1[%c0, %c0_0] : memref<128x16xbf16, #tpu.memory_space<vmem>>, vector<128x16xbf16>
    %c0_1 = arith.constant 0 : index
    %c0_2 = arith.constant 0 : index
    %1 = vector.load %arg2[%c0_1, %c0_2] : memref<16x128xbf16, #tpu.memory_space<vmem>>, vector<16x128xbf16>
    %cst = arith.constant dense<0.000000e+00> : vector<128x128xf32>
    %2 = tpu.matmul %0, %1, %cst {dimension_numbers = #tpu.dot_dimension_numbers<[1], [0], [0], [1], [0, 0, 1, 1], [], []>} : vector<128x16xbf16>, vector<16x128xbf16>, vector<128x128xf32> -> vector<128x128xf32>
    %c0_3 = arith.constant 0 : index
    %c0_4 = arith.constant 0 : index
    %3 = vector.load %arg3[%c0_3, %c0_4] : memref<1x128xf32, #tpu.memory_space<vmem>>, vector<1x128xf32>
    %4 = vector.broadcast %3 : vector<1x128xf32> to vector<128x128xf32>
    %5 = arith.addf %2, %4 : vector<128x128xf32>
    %c0_5 = arith.constant 0 : index
    %c0_6 = arith.constant 0 : index
    %6 = vector.load %arg4[%c0_5, %c0_6] : memref<128x128xf32, #tpu.memory_space<vmem>>, vector<128x128xf32>
    tpu.vector_store %arg4[%c0_5, %c0_6], %5 {strides = array<i32>} : memref<128x128xf32, #tpu.memory_space<vmem>>, vector<128x128xf32>,
    return
  }
  func.func @transform_0(%arg0: i32) -> (i32, i32) {
    %c0_i32 = arith.constant 0 : i32
    %c0_i32_0 = arith.constant 0 : i32
    return %arg0, %c0_i32 : i32, i32
  }
  func.func @transform_1(%arg0: i32) -> (i32, i32) {
    %c0_i32 = arith.constant 0 : i32
    %c0_i32_0 = arith.constant 0 : i32
    %c0_i32_1 = arith.constant 0 : i32
    return %c0_i32, %c0_i32_0 : i32, i32
  }
  func.func @transform_2(%arg0: i32) -> (i32, i32) {
    %c0_i32 = arith.constant 0 : i32
    %c0_i32_0 = arith.constant 0 : i32
    %c0_i32_1 = arith.constant 0 : i32
    return %c0_i32, %c0_i32_0 : i32, i32
  }
  func.func @transform_3(%arg0: i32) -> (i32, i32) {
    %c0_i32 = arith.constant 0 : i32
    %c0_i32_0 = arith.constant 0 : i32
    return %arg0, %c0_i32 : i32, i32
  }
}

</mosaic_0001>

<bundles_post_ra>
// kernel: tpu_custom_call.1
= control target key start
LH: loop header
LB: loop body
LE: loop exit
PB: predicated region body
PF: predicated region fallthrough
CT: control target
= control target key end

     0   :  { %vm84_vm0 = vcmask 130048   ;;  %s342_s0 = inlined_call_operand.vmem [shape: bf16[128,16], index: 0, kind: input, shape index: {}]   ;;  %s343_s1 = inlined_call_operand.vmem [shape: bf16[16,128], index: 1, kind: input, shape index: {}]   ;;  %s344_s2 = inlined_call_operand.vmem [shape: f32[1,128], index: 2, kind: input, shape index: {}]   ;;  %s345_s3 = inlined_call_operand.hbm [shape: f32[128,128], index: 3, kind: output, shape index: {}]  }
   0x1   :  { %v244_v0 = vld [vmem:[%s343_s1] sm:$0xff]  ;;  %v238_v2 = vld [vmem:[%s342_s0 + $0x10] sm:$0xff] }
   0x2   :  { %v236_v1 = vld [vmem:[%s342_s0] sm:$0xff]  ;;  %116 = vmatpush.bf16.msra.mxu0 %v244_v0  ;;  %245 = vmatpush.bf16.msra.mxu1 %v244_v0  ;;  %v242_v4 = vld [vmem:[%s342_s0 + $0x30] sm:$0xff] }
   0x3   :  { %v240_v3 = vld [vmem:[%s342_s0 + $0x20] sm:$0xff]  ;;  %246 = vmatpush.bf16.msra.mxu2 %v244_v0  ;;  %247 = vmatpush.bf16.msra.mxu3 %v244_v0 }
   0x4   :  { %8 = vsyncpa [#allocation3], 0  ;;  %v237_v5 = vld [vmem:[%s342_s0 + $0x8] sm:$0xff]  ;;  %v239_v6 = vld [vmem:[%s342_s0 + $0x18] sm:$0xff]  ;;  %s180_s6 = sshll.u32 %s345_s3, 4  ;;  %s279_s7 = smov 128   ;;  %s181_s6 = int_to_ptr.hbm [resolvable:$true] %s180_s6 }
   0x5   :  { %228 = vmatmul.msk.bf16.vlgmr.msra.gmra.mxu0 %vm84_vm0, %v236_v1  ;;  %230 = vmatmul.msk.bf16.vlgmr.msra.gmra.mxu1 %vm84_vm0, %v238_v2  ;;  %v241_v7 = vld [vmem:[%s342_s0 + $0x28] sm:$0xff]  ;;  %v243_v8 = vld [vmem:[%s342_s0 + $0x38] sm:$0xff]  ;;  %v251_v9 = vld [vmem:[%s344_s2] ss:$0 sm:$0xff]  ;;  %s278_s0 = smov [#allocation2]   ;;  %s280_s8 = smov 8  }
   0x6   :  { %232 = vmatmul.msk.bf16.vlgmr.msra.gmra.mxu2 %vm84_vm0, %v240_v3  ;;  %234 = vmatmul.msk.bf16.vlgmr.msra.gmra.mxu3 %vm84_vm0, %v242_v4  ;;  %s178_s2 = sshll.u32 %s278_s0, 4  ;;  %s179_s2 = int_to_ptr.vmem [resolvable:$true] %s178_s2 }
  0x15   :  { %229 = vmatmul.msk.bf16.gmra.mxu0 %vm84_vm0, %v237_v5  ;;  %231 = vmatmul.msk.bf16.gmra.mxu1 %vm84_vm0, %v239_v6 }
  0x16   :  { %233 = vmatmul.msk.bf16.gmra.mxu2 %vm84_vm0, %v241_v7  ;;  %235 = vmatmul.msk.bf16.gmra.mxu3 %vm84_vm0, %v243_v8 }
  0x82   :  { %v118_v10 = vpop.f32.mrf.mxu0  ;;  %v128_v11 = vpop.f32.mrf.mxu1 }
  0x83   :  { %v119_v12 = vadd.f32 %v251_v9, %v118_v10  ;;  %v129_v13 = vadd.f32 %v251_v9, %v128_v11 }
  0x85   :  { %158 = vst [vmem:[#allocation2] sm:$0xff] %v119_v12 }
  0x86   :  { %162 = vst [vmem:[#allocation2 + $0x20] sm:$0xff] %v129_v13 }
  0x89   :  { %v138_v14 = vpop.f32.mrf.mxu2  ;;  %v148_v15 = vpop.f32.mrf.mxu3 }
  0x8a   :  { %v139_v16 = vadd.f32 %v251_v9, %v138_v14  ;;  %v149_v17 = vadd.f32 %v251_v9, %v148_v15  ;;  %v120_v18 = vpop.f32.mrf.mxu0  ;;  %v130_v19 = vpop.f32.mrf.mxu1 }
  0x8b   :  { %v121_v20 = vadd.f32 %v251_v9, %v120_v18  ;;  %v131_v21 = vadd.f32 %v251_v9, %v130_v19 }
  0x8c   :  { %166 = vst [vmem:[#allocation2 + $0x40] sm:$0xff] %v139_v16 }
  0x8d   :  { %170 = vst [vmem:[#allocation2 + $0x60] sm:$0xff] %v149_v17 }
  0x8e   :  { %159 = vst [vmem:[#allocation2 + $0x8] sm:$0xff] %v121_v20 }
  0x8f   :  { %163 = vst [vmem:[#allocation2 + $0x28] sm:$0xff] %v131_v21 }
  0x91   :  { %v140_v22 = vpop.f32.mrf.mxu2  ;;  %v150_v23 = vpop.f32.mrf.mxu3 }
  0x92   :  { %v141_v24 = vadd.f32 %v251_v9, %v140_v22  ;;  %v151_v25 = vadd.f32 %v251_v9, %v150_v23  ;;  %v123_v26 = vpop.f32.mrf.mxu0  ;;  %v133_v27 = vpop.f32.mrf.mxu1 }
  0x93   :  { %v124_v28 = vadd.f32 %v251_v9, %v123_v26  ;;  %v134_v29 = vadd.f32 %v251_v9, %v133_v27 }
  0x94   :  { %167 = vst [vmem:[#allocation2 + $0x48] sm:$0xff] %v141_v24 }
  0x95   :  { %171 = vst [vmem:[#allocation2 + $0x68] sm:$0xff] %v151_v25 }
  0x96   :  { %160 = vst [vmem:[#allocation2 + $0x10] sm:$0xff] %v124_v28 }
  0x97   :  { %164 = vst [vmem:[#allocation2 + $0x30] sm:$0xff] %v134_v29 }
  0x99   :  { %v143_v30 = vpop.f32.mrf.mxu2  ;;  %v153_v31 = vpop.f32.mrf.mxu3 }
  0x9a   :  { %v144_v32 = vadd.f32 %v251_v9, %v143_v30  ;;  %v154_v33 = vadd.f32 %v251_v9, %v153_v31  ;;  %v125_v34 = vpop.f32.mrf.mxu0  ;;  %v135_v35 = vpop.f32.mrf.mxu1 }
  0x9b   :  { %v126_v36 = vadd.f32 %v251_v9, %v125_v34  ;;  %v136_v37 = vadd.f32 %v251_v9, %v135_v35 }
  0x9c   :  { %168 = vst [vmem:[#allocation2 + $0x50] sm:$0xff] %v144_v32 }
  0x9d   :  { %172 = vst [vmem:[#allocation2 + $0x70] sm:$0xff] %v154_v33 }
  0x9e   :  { %161 = vst [vmem:[#allocation2 + $0x18] sm:$0xff] %v126_v36 }
  0x9f   :  { %165 = vst [vmem:[#allocation2 + $0x38] sm:$0xff] %v136_v37 }
  0xa1   :  { %v145_v38 = vpop.f32.mrf.mxu2  ;;  %v155_v39 = vpop.f32.mrf.mxu3 }
  0xa2   :  { %v146_v40 = vadd.f32 %v251_v9, %v145_v38  ;;  %v156_v41 = vadd.f32 %v251_v9, %v155_v39 }
  0xa4   :  { %169 = vst [vmem:[#allocation2 + $0x58] sm:$0xff] %v146_v40 }
  0xa5   :  { %173 = vst [vmem:[#allocation2 + $0x78] sm:$0xff] %v156_v41 }
  0xa6   :  { %186 = dma.vmem_to_hbm [thread:$0]  %s179_s2, 2048, %s181_s6, [#allocation3], %s279_s7, %s279_s7, %s280_s8  }
  0xa7   :  { %276 = dma.done.wait [#allocation3], 2048  }
  0xa8   :  { %277 = vsyncadd [#allocation3], 4294965248 }
  0xa9   :  { %191 = vsyncpa [#allocation3], 1 }

</bundles_post_ra>
